<compile_context>
chip_gen: v5e
topology: v5e:2x2
jax: 0.10.0
libtpu: 0.0.40
codegen_flags: <defaults>
</compile_context>

<pallas_src>
import jax
import jax.numpy as jnp
from jax.experimental import pallas as pl
from jax.experimental.pallas import tpu as pltpu


# Weights (w1 + w2) must fit under this budget (plus headroom) to take the
# resident single-pass path.  Conservative so it is safe even on v7x (64 MiB).
_RESIDENT_WEIGHT_BUDGET = 16 << 20


# ---------------------------------------------------------------------------
# in-kernel math helpers
# ---------------------------------------------------------------------------
def _gelu(x):
    # GELU tanh approximation (matches the reference GELU module).
    return 0.5 * x * (1.0 + jnp.tanh(
        jnp.sqrt(2.0 / jnp.pi) * (x + 0.044715 * x ** 3)))


# ---------------------------------------------------------------------------
# Kernel A: weights-resident single pass (no hidden-dim reduction axis)
# ---------------------------------------------------------------------------
def ffn_kernel_resident(x_ref, w1_ref, b1_ref, w2_ref, b2_ref, o_ref):
    # (TM, D) @ (D, H) -> f32 (TM, H); bias + GELU fused.
    h = jnp.dot(x_ref[...], w1_ref[...], preferred_element_type=jnp.float32)
    h = _gelu(h + b1_ref[...].astype(jnp.float32))
    # (TM, H) @ (H, D) -> f32 (TM, D); add output bias, downcast once.
    # NOTE: h is intentionally downcast to the weight dtype (bf16) before the
    # second MXU matmul; accumulation stays f32.
    o = jnp.dot(h.astype(w2_ref.dtype), w2_ref[...],
                preferred_element_type=jnp.float32)
    o_ref[...] = (o + b2_ref[...].astype(jnp.float32)).astype(o_ref.dtype)


# ---------------------------------------------------------------------------
# Kernel B: hidden-dim streamed (reduction over hidden tiles, f32 accumulator)
# ---------------------------------------------------------------------------
def ffn_kernel_streamed(x_ref, w1_ref, b1_ref, w2_ref, b2_ref, o_ref, acc_ref):
    k = pl.program_id(1)  # hidden-tile index (trailing reduction axis)

    @pl.when(k == 0)
    def _():
        acc_ref[...] = jnp.zeros_like(acc_ref)

    h = jnp.dot(x_ref[...], w1_ref[...], preferred_element_type=jnp.float32)
    h = _gelu(h + b1_ref[...].astype(jnp.float32))
    acc_ref[...] += jnp.dot(h.astype(w2_ref.dtype), w2_ref[...],
                            preferred_element_type=jnp.float32)

    @pl.when(k == pl.num_programs(1) - 1)
    def _():
        o_ref[...] = (acc_ref[...] + b2_ref[...].astype(jnp.float32)
                      ).astype(o_ref.dtype)


# ---------------------------------------------------------------------------
# tile selection helpers
# ---------------------------------------------------------------------------
def _pick_tile(total, target, unit=8):
    """Largest tile <= target that divides `total` and is a multiple of `unit`."""
    if total <= target:
        return total
    t = max(unit, (target // unit) * unit)
    while t >= unit:
        if total % t == 0:
            return t
        t -= unit
    return total  # fall back to the full extent (always divides)


def _default_vmem_limit():
    try:
        phys = int(pltpu.get_tpu_info().vmem_capacity_bytes)
    except Exception:
        phys = 64 << 20  # conservative (v7x per-TC)
    # ~75% of physical, capped at ~100 MiB, floor 32 MiB.
    return min(100 << 20, max(32 << 20, (phys * 3) // 4))


# ---------------------------------------------------------------------------
# wrapper
# ---------------------------------------------------------------------------
def feed_forward(x, w1, b1, w2, b2, *, tm=None, th=None,
                 vmem_limit_bytes=None, force_streamed=False):
    """y = GELU(x @ w1 + b1) @ w2 + b2 ; x: [..., D], w1: (D, H), w2: (H, D)."""
    orig_shape = x.shape
    D = orig_shape[-1]
    H = w1.shape[1]
    xf = x.reshape(-1, D)
    M = xf.shape[0]

    # Accept PyTorch-style 1-D biases.
    b1 = b1.reshape(1, H)
    b2 = b2.reshape(1, D)

    x_bytes = jnp.dtype(x.dtype).itemsize
    w_bytes = jnp.dtype(w1.dtype).itemsize
    weight_bytes = 2 * D * H * w_bytes

    if vmem_limit_bytes is None:
        vmem_limit_bytes = _default_vmem_limit()

    use_resident = (not force_streamed) and (weight_bytes <= _RESIDENT_WEIGHT_BUDGET)

    flops = 4 * M * D * H                # two matmuls, 2 flops / MAC
    transcendentals = M * H              # tanh inside GELU

    if use_resident:
        # --- weights-resident single pass ---------------------------------
        if tm is None:
            # VMEM budget after the resident weights (double-buffer headroom).
            budget = max(1 << 20, vmem_limit_bytes - 2 * weight_bytes - (2 << 20))
            per_row = 2 * 2 * D * x_bytes + 4 * H   # x/out double-buffered + f32 h
            tm_cap = max(8, budget // max(per_row, 1))
            tm = _pick_tile(M, min(512, tm_cap))
        else:
            tm = _pick_tile(M, tm)
        # Keep >= 2 row tiles when possible so the parallel axis shards across
        # both TensorCores on v7x.
        if M // tm < 2 and M >= 16 and M % 2 == 0 and (M // 2) % 8 == 0:
            tm = M // 2
        assert M % tm == 0

        cost = pl.CostEstimate(
            flops=flops, transcendentals=transcendentals,
            bytes_accessed=(x_bytes * M * D            # x in
                            + x_bytes * M * D          # out
                            + weight_bytes             # w1 + w2 once
                            + 4 * (H + D)))            # biases (f32)

        out = pl.pallas_call(
            ffn_kernel_resident,
            out_shape=jax.ShapeDtypeStruct((M, D), x.dtype),
            grid_spec=pltpu.PrefetchScalarGridSpec(
                num_scalar_prefetch=0,
                grid=(M // tm,),
                in_specs=[
                    pl.BlockSpec((tm, D), lambda i: (i, 0)),   # x row tile
                    pl.BlockSpec((D, H), lambda i: (0, 0)),    # w1 (resident)
                    pl.BlockSpec((1, H), lambda i: (0, 0)),    # b1 (resident)
                    pl.BlockSpec((H, D), lambda i: (0, 0)),    # w2 (resident)
                    pl.BlockSpec((1, D), lambda i: (0, 0)),    # b2 (resident)
                ],
                out_specs=pl.BlockSpec((tm, D), lambda i: (i, 0)),
            ),
            compiler_params=pltpu.CompilerParams(
                dimension_semantics=("parallel",),
                vmem_limit_bytes=vmem_limit_bytes),
            cost_estimate=cost,
        )(xf, w1, b1, w2, b2)
        return out.reshape(orig_shape)

    # --- streamed path: hidden dim tiled as trailing reduction axis --------
    tm = _pick_tile(M, 512 if tm is None else tm)
    th = _pick_tile(H, 512 if th is None else th, unit=128)
    if M // tm < 2 and M >= 16 and M % 2 == 0 and (M // 2) % 8 == 0:
        tm = M // 2
    assert M % tm == 0 and H % th == 0
    grid = (M // tm, H // th)

    cost = pl.CostEstimate(
        flops=flops, transcendentals=transcendentals,
        bytes_accessed=(x_bytes * M * D                       # x in
                        + x_bytes * M * D                     # out
                        + (M // tm) * weight_bytes            # weights streamed per row tile
                        + 4 * (H + D)))

    out = pl.pallas_call(
        ffn_kernel_streamed,
        out_shape=jax.ShapeDtypeStruct((M, D), x.dtype),
        grid_spec=pltpu.PrefetchScalarGridSpec(
            num_scalar_prefetch=0,
            grid=grid,
            in_specs=[
                pl.BlockSpec((tm, D), lambda i, k: (i, 0)),   # x row tile (const in k)
                pl.BlockSpec((D, th), lambda i, k: (0, k)),   # w1 column tile
                pl.BlockSpec((1, th), lambda i, k: (0, k)),   # b1 tile
                pl.BlockSpec((th, D), lambda i, k: (k, 0)),   # w2 row tile
                pl.BlockSpec((1, D), lambda i, k: (0, 0)),    # b2 (full)
            ],
            out_specs=pl.BlockSpec((tm, D), lambda i, k: (i, 0)),
            scratch_shapes=[pltpu.VMEM((tm, D), jnp.float32)],
        ),
        compiler_params=pltpu.CompilerParams(
            dimension_semantics=("parallel", "arbitrary"),
            vmem_limit_bytes=vmem_limit_bytes),
        cost_estimate=cost,
    )(xf, w1, b1, w2, b2)
    return out.reshape(orig_shape)


# ---------------------------------------------------------------------------
# pure-JAX f32 reference for correctness check
# ---------------------------------------------------------------------------
def feed_forward_ref(x, w1, b1, w2, b2):
    xf = x.astype(jnp.float32)
    h = _gelu(xf @ w1.astype(jnp.float32) + b1.astype(jnp.float32))
    return h @ w2.astype(jnp.float32) + b2.astype(jnp.float32)


# ---------------------------------------------------------------------------
if __name__ == "__main__":
    cfg = dict(emb_dim=128)
    expansion_rate = 4
    D = cfg['emb_dim']
    H = expansion_rate * D          # 512
    B, T = 2, 64                    # M = B*T = 128 rows

    key = jax.random.PRNGKey(0)
    kx, k1, kb1, k2, kb2 = jax.random.split(key, 5)

    # bf16 activations / weights (MXU-native), f32 biases (1-D, PyTorch-style).
    x = jax.random.normal(kx, (B, T, D), jnp.float32).astype(jnp.bfloat16)
    w1 = (jax.random.normal(k1, (D, H), jnp.float32) * 0.02).astype(jnp.bfloat16)
    b1 = jax.random.normal(kb1, (H,), jnp.float32) * 0.02
    w2 = (jax.random.normal(k2, (H, D), jnp.float32) * 0.02).astype(jnp.bfloat16)
    b2 = jax.random.normal(kb2, (D,), jnp.float32) * 0.02

    ref = feed_forward_ref(x, w1.reshape(D, H), b1, w2, b2)

    # Path 1: weights-resident fast path (default for this small D*H).
    out_res = jax.block_until_ready(feed_forward(x, w1, b1, w2, b2))
    assert out_res.shape == (B, T, D)
    err_res = float(jnp.max(jnp.abs(out_res.astype(jnp.float32) - ref)))
    assert jnp.allclose(out_res.astype(jnp.float32), ref,
                        atol=2e-2, rtol=2e-2), err_res

    # Path 2: streamed (hidden-tiled) path, exercised explicitly.
    out_str = jax.block_until_ready(
        feed_forward(x, w1, b1, w2, b2, tm=64, th=256, force_streamed=True))
    err_str = float(jnp.max(jnp.abs(out_str.astype(jnp.float32) - ref)))
    assert jnp.allclose(out_str.astype(jnp.float32), ref,
                        atol=2e-2, rtol=2e-2), err_str

    print("KERNEL_OK")
</pallas_src>

<mosaic_0001>
module attributes {stable_mosaic.version = 11 : i64} {
  func.func @ffn_kernel_resident(%arg0: i32, %arg1: memref<64x128xbf16, #tpu.memory_space<vmem>>, %arg2: memref<128x512xbf16, #tpu.memory_space<vmem>>, %arg3: memref<1x512xf32, #tpu.memory_space<vmem>>, %arg4: memref<512x128xbf16, #tpu.memory_space<vmem>>, %arg5: memref<1x128xf32, #tpu.memory_space<vmem>>, %arg6: memref<64x128xbf16, #tpu.memory_space<vmem>>) attributes {dimension_semantics = [#tpu.dimension_semantics<parallel>], iteration_bounds = array<i64: 2>, scalar_prefetch = 0 : i64, scratch_operands = 0 : i64, tpu.core_type = #tpu.core_type<tc>, window_params = [{transform_indices = @transform_0, window_bounds = array<i64: 64, 128>}, {pipeline_mode = #tpu.pipeline_mode<synchronous>, transform_indices = @transform_1, window_bounds = array<i64: 128, 512>}, {pipeline_mode = #tpu.pipeline_mode<synchronous>, transform_indices = @transform_2, window_bounds = array<i64: 1, 512>}, {pipeline_mode = #tpu.pipeline_mode<synchronous>, transform_indices = @transform_3, window_bounds = array<i64: 512, 128>}, {pipeline_mode = #tpu.pipeline_mode<synchronous>, transform_indices = @transform_4, window_bounds = array<i64: 1, 128>}, {transform_indices = @transform_5, window_bounds = array<i64: 64, 128>}]} {
    %c0 = arith.constant 0 : index
    %c0_0 = arith.constant 0 : index
    %0 = vector.load %arg1[%c0, %c0_0] : memref<64x128xbf16, #tpu.memory_space<vmem>>, vector<64x128xbf16>
    %c0_1 = arith.constant 0 : index
    %c0_2 = arith.constant 0 : index
    %1 = vector.load %arg2[%c0_1, %c0_2] : memref<128x512xbf16, #tpu.memory_space<vmem>>, vector<128x512xbf16>
    %cst = arith.constant dense<0.000000e+00> : vector<64x512xf32>
    %2 = tpu.matmul %0, %1, %cst {dimension_numbers = #tpu.dot_dimension_numbers<[1], [0], [0], [1], [0, 0, 1, 1], [], []>} : vector<64x128xbf16>, vector<128x512xbf16>, vector<64x512xf32> -> vector<64x512xf32>
    %c0_3 = arith.constant 0 : index
    %c0_4 = arith.constant 0 : index
    %3 = vector.load %arg3[%c0_3, %c0_4] : memref<1x512xf32, #tpu.memory_space<vmem>>, vector<1x512xf32>
    %4 = vector.broadcast %3 : vector<1x512xf32> to vector<64x512xf32>
    %5 = arith.addf %2, %4 : vector<64x512xf32>
    %cst_5 = arith.constant 5.000000e-01 : f32
    %6 = vector.broadcast %cst_5 : f32 to vector<64x512xf32>
    %7 = arith.mulf %6, %5 : vector<64x512xf32>
    %cst_6 = arith.constant 0.636619746 : f32
    %8 = math.sqrt %cst_6 : f32
    %9 = arith.mulf %5, %5 : vector<64x512xf32>
    %10 = arith.mulf %5, %9 : vector<64x512xf32>
    %cst_7 = arith.constant 4.471500e-02 : f32
    %11 = vector.broadcast %cst_7 : f32 to vector<64x512xf32>
    %12 = arith.mulf %11, %10 : vector<64x512xf32>
    %13 = arith.addf %5, %12 : vector<64x512xf32>
    %14 = vector.broadcast %8 : f32 to vector<64x512xf32>
    %15 = arith.mulf %14, %13 : vector<64x512xf32>
    %16 = math.tanh %15 : vector<64x512xf32>
    %cst_8 = arith.constant 1.000000e+00 : f32
    %17 = vector.broadcast %cst_8 : f32 to vector<64x512xf32>
    %18 = arith.addf %17, %16 : vector<64x512xf32>
    %19 = arith.mulf %7, %18 : vector<64x512xf32>
    %20 = arith.truncf %19 : vector<64x512xf32> to vector<64x512xbf16>
    %c0_9 = arith.constant 0 : index
    %c0_10 = arith.constant 0 : index
    %21 = vector.load %arg4[%c0_9, %c0_10] : memref<512x128xbf16, #tpu.memory_space<vmem>>, vector<512x128xbf16>
    %cst_11 = arith.constant dense<0.000000e+00> : vector<64x128xf32>
    %22 = tpu.matmul %20, %21, %cst_11 {dimension_numbers = #tpu.dot_dimension_numbers<[1], [0], [0], [1], [0, 0, 1, 1], [], []>} : vector<64x512xbf16>, vector<512x128xbf16>, vector<64x128xf32> -> vector<64x128xf32>
    %c0_12 = arith.constant 0 : index
    %c0_13 = arith.constant 0 : index
    %23 = vector.load %arg5[%c0_12, %c0_13] : memref<1x128xf32, #tpu.memory_space<vmem>>, vector<1x128xf32>
    %24 = vector.broadcast %23 : vector<1x128xf32> to vector<64x128xf32>
    %25 = arith.addf %22, %24 : vector<64x128xf32>
    %26 = arith.truncf %25 : vector<64x128xf32> to vector<64x128xbf16>
    %c0_14 = arith.constant 0 : index
    %c0_15 = arith.constant 0 : index
    %27 = vector.load %arg6[%c0_14, %c0_15] : memref<64x128xbf16, #tpu.memory_space<vmem>>, vector<64x128xbf16>
    tpu.vector_store %arg6[%c0_14, %c0_15], %26 {strides = array<i32>} : memref<64x128xbf16, #tpu.memory_space<vmem>>, vector<64x128xbf16>,
    return
  }
  func.func @transform_0(%arg0: i32) -> (i32, i32) {
    %c0_i32 = arith.constant 0 : i32
    %c0_i32_0 = arith.constant 0 : i32
    return %arg0, %c0_i32 : i32, i32
  }
  func.func @transform_1(%arg0: i32) -> (i32, i32) {
    %c0_i32 = arith.constant 0 : i32
    %c0_i32_0 = arith.constant 0 : i32
    %c0_i32_1 = arith.constant 0 : i32
    return %c0_i32, %c0_i32_0 : i32, i32
  }
  func.func @transform_2(%arg0: i32) -> (i32, i32) {
    %c0_i32 = arith.constant 0 : i32
    %c0_i32_0 = arith.constant 0 : i32
    %c0_i32_1 = arith.constant 0 : i32
    return %c0_i32, %c0_i32_0 : i32, i32
  }
  func.func @transform_3(%arg0: i32) -> (i32, i32) {
    %c0_i32 = arith.constant 0 : i32
    %c0_i32_0 = arith.constant 0 : i32
    %c0_i32_1 = arith.constant 0 : i32
    return %c0_i32, %c0_i32_0 : i32, i32
  }
  func.func @transform_4(%arg0: i32) -> (i32, i32) {
    %c0_i32 = arith.constant 0 : i32
    %c0_i32_0 = arith.constant 0 : i32
    %c0_i32_1 = arith.constant 0 : i32
    return %c0_i32, %c0_i32_0 : i32, i32
  }
  func.func @transform_5(%arg0: i32) -> (i32, i32) {
    %c0_i32 = arith.constant 0 : i32
    %c0_i32_0 = arith.constant 0 : i32
    return %arg0, %c0_i32 : i32, i32
  }
}

</mosaic_0001>

<bundles_post_ra>
// kernel: tpu_custom_call.1
= control target key start
LH: loop header
LB: loop body
LE: loop exit
PB: predicated region body
PF: predicated region fallthrough
CT: control target
= control target key end

     0   :  { %10 = vsyncpa [#allocation3], 0  ;;  %s2692_s0 = inlined_call_operand.hbm [shape: bf16[128,128], index: 0, kind: input, shape index: {}]   ;;  %s2693_s1 = inlined_call_operand.hbm [shape: bf16[128,512], index: 1, kind: input, shape index: {}]   ;;  %s2694_s2 = inlined_call_operand.hbm [shape: f32[1,512], index: 2, kind: input, shape index: {}]   ;;  %s2695_s3 = inlined_call_operand.hbm [shape: bf16[512,128], index: 3, kind: input, shape index: {}]   ;;  %s2696_s4 = inlined_call_operand.vmem [shape: f32[1,128], index: 4, kind: input, shape index: {}]   ;;  %s2697_s5 = inlined_call_operand.hbm [shape: bf16[128,128], index: 5, kind: output, shape index: {}]  }
   0x1   :  { %12 = vsyncpa [#allocation3 + $0x1], 0 }
   0x2   :  { %13 = vsyncpa [#allocation6], 0 }
   0x3   :  { %14 = vsyncpa [#allocation9], 0 }
   0x4   :  { %15 = vsyncpa [#allocation4], 0 }
   0x5   :  { %17 = vsyncpa [#allocation4 + $0x1], 0  ;;  %s2227_s18 = smov 0   ;;  %s2229_s19 = smov 0  }
   0x6   :  { %s2231_s20 = smov 0   ;;  %s2233_s21 = smov 0  }
   0x7 LB: > { %s2248_s22 = sadd.s32 4294967295, %s2186_s21   ;;  %s1459_s23 = sadd.s32 4294967294, %s2186_s21   ;;  %s2186_s21 = sphi %s2233_s21, %s2710_s21   ;;  %s2182_s20 = sphi %s2231_s20, %s2709_s20   ;;  %s2178_s19 = sphi %s2229_s19, %s2708_s19   ;;  %s2174_s18 = sphi %s2227_s18, %s2707_s18  }
   0x8   : > { %p43_p0 = scmp.ne.s32.totalorder %s2178_s19, %s2174_s18  ;;  %p44_p1 = scmp.eq.s32.totalorder %s2248_s22, 0 }
   0x9   : > { %p151_p2 = scmp.eq.s32.totalorder %s2248_s22, 1  ;;  %p157_p3 = scmp.eq.s32.totalorder %s1459_s23, 1 }
   0xa   : > { %p2257_p4 = por %p44_p1, %p43_p0  ;;  %p1460_p5 = scmp.ge.s32.totalorder %s2186_s21, 1 }
   0xb   : > { %p2262_p6 = por %p157_p3, %p43_p0  ;;  %p164_p7 = scmp.lt.s32.totalorder %s2186_s21, 3 }
   0xc   : > { %s175_s28 = sshll.u32 %s2693_s1, 4  ;;  %s2188_s30 = smov [#allocation5]   ;;  %s176_s28 = int_to_ptr.hbm [resolvable:$true] %s175_s28 }
   0xd   : > { %p2270_p8 = pnand %p1460_p5, %p164_p7  ;;  %s177_s6 = sshll.u32 %s2188_s30, 4  ;;  %s178_s6 = int_to_ptr.vmem [resolvable:$true] %s177_s6 }
   0xe   : > { %s190_s10 = sshll.u32 %s2694_s2, 4  ;;  %s2189_s11 = smov 256   ;;  %s191_s10 = int_to_ptr.hbm [resolvable:$true] %s190_s10 }
   0xf   : > { %p1860_p9 = pneg %p2270_p8  ;;  %s2190_s12 = smov 16  }
  0x10   : > { %s2191_s13 = smov [#allocation7]   ;;  %s201_s17 = sshll.u32 %s2695_s3, 4  ;;  %s202_s17 = int_to_ptr.hbm [resolvable:$true] %s201_s17 }
  0x11   : > { %p2278_p10 = pnand %p1860_p9, %p44_p1  ;;  %s192_s14 = sshll.u32 %s2191_s13, 4  ;;  %s193_s14 = int_to_ptr.vmem [resolvable:$true] %s192_s14 }
  0x12   : > { %s2192_s23 = smov [#allocation8]   ;;  %s2698_s27 = smov 64  }
  0x13   : > { %1863 = dma.hbm_to_vmem [thread:$0]  (!%p2278_p10), %s176_s28, 4096, %s178_s6, [#allocation6], %s2189_s11, %s2189_s11, %s2190_s12  }
  0x14   : > { %1866 = dma.hbm_to_vmem [thread:$0]  (!%p2278_p10), %s191_s10, 64, %s193_s14, [#allocation6]  }
  0x15   : > { %s203_s26 = sshll.u32 %s2192_s23, 4  ;;  %s2194_s28 = smov 4   ;;  %s204_s26 = int_to_ptr.vmem [resolvable:$true] %s203_s26 }
  0x16   : > { %1869 = dma.hbm_to_vmem [thread:$0]  (!%p2278_p10), %s202_s17, 4096, %s204_s26, [#allocation9], %s2698_s27, %s2698_s27, %s2194_s28  }
  0x17   : > { %s2299_s30 = sadd.s32 1, %s2186_s21   ;;  %s30_s8 = sadd.s32 1, %s2182_s20 }
  0x18   : > { %s27_s6 = ssub.s32 %s2186_s21, %s2299_s30  ;;  %p37_p13 = scmp.ne.s32.totalorder %s2182_s20, %s2178_s19 }
  0x19   : > { %p28_p12 = scmp.eq.s32.totalorder %s27_s6, 0  ;;  %p38_p0 = scmp.eq.s32.totalorder %s2186_s21, 0 }
  0x1a   : > { %p2312_p3 = por %p151_p2, %p37_p13  ;;  %p1881_p5 = scmp.lt.s32.totalorder %s2186_s21, 2 }
  0x1b   : > { %s2308_s9 = scalar_select %p28_p12, %s2182_s20, %s30_s8  }
  0x1c   : > { %s220_s7 = sand.u32 1, %s2182_s20   ;;  %s1751_s11 = sshll.u32 %s2186_s21, 5 }
  0x1d   : > { %p39_p7 = por %p38_p0, %p37_p13  ;;  %s1465_s12 = sshll.u32 %s220_s7, 5 }
  0x1e   : > { %s229_s15 = scalar_lea.hbm %s2692_s0, %s1751_s11  ;;  %s224_s17 = scalar_lea.vmem [#allocation2], %s1465_s12 }
  0x1f   : > { %s230_s16 = sshll.u32 %s229_s15, 4  ;;  %s232_s23 = sshll.u32 %s224_s17, 4  ;;  %s231_s16 = int_to_ptr.hbm [resolvable:$true] %s230_s16  ;;  %s233_s23 = int_to_ptr.vmem [resolvable:$true] %s232_s23 }
  0x20   : > { %p2322_p9 = pnand %p1881_p5, %p39_p7  ;;  %s221_s6 = scalar_lea.sflag [#allocation3], %s220_s7 }
  0x21   : > { %s2082_s8 = sshra.s32 %s231_s16, 4  ;;  %s2089_s12 = scalar_lea.hbm %s2692_s0, 64  ;;  %s2083_s8 = int_to_ptr.hbm [resolvable:$true] %s2082_s8 }
  0x22   : > { %s2084_s27 = scalar_lea.hbm %s2083_s8, 32  ;;  %p2086_p10 = pneg %p2322_p9 }
  0x23   : > { %p2085_p2 = scmp.ne.s32.totalorder %s2083_s8, %s2084_s27  ;;  %p2090_p0 = scmp.lt.s32.totalorder %s2083_s8, %s2692_s0 }
  0x24   : > { %p2091_p5 = scmp.lt.s32.totalorder %s2089_s12, %s2084_s27 }
  0x25   : > { %p2087_p12 = pnand %p2086_p10, %p2085_p2 }
  0x26   : > { %p2092_p7 = por %p2091_p5, %p2090_p0 }
  0x27   : > { %p2088_p13 = pneg %p2087_p12 }
  0x29   : > { %p2093_p11 = pnand %p2092_p7, %p2088_p13 }
  0x2b   : > { %2096 = shalt.err (!%p2093_p11)
}
  0x2c   : > { %s2705_s7 = smov 64   ;;  %244 = sbr.rel (%p2270_p8) target bundleno = 465 (0x1d1), region = 40 }
  0x2d   : > { %1873 = dma.hbm_to_vmem [thread:$0]  (!%p2322_p9), %s231_s16, 512, %s233_s23, %s221_s6, %s2705_s7, %s2705_s7, %s2194_s28  }
  0x2e   : > { %s2342_s17 = sand.u32 (!%p2270_p8), 1, %s2178_s19  }
  0x2f   : > { %s1469_s27 = sshll.u32 (!%p2270_p8), %s2342_s17, 5  ;;  %s247_s8 = scalar_lea.sflag (!%p2270_p8), [#allocation3], %s2342_s17 }
  0x30   : > { %s2348_s11 = scalar_lea.vmem (!%p2270_p8), [#allocation2], %s1469_s27 }
  0x31   : > { %2157 = dma.done.wait (%p2257_p4), %s247_s8, 512  }
  0x32   : > { %2159 = vsyncadd (%p2257_p4), %s247_s8, 4294966784 }
  0x33   : > { %2161 = dma.done.wait (%p44_p1), [#allocation6], 4160  }
  0x34   : > { %2163 = vsyncadd (%p44_p1), [#allocation6], 4294963136 }
  0x35   : > { %2165 = dma.done.wait (%p44_p1), [#allocation9], 4096  }
  0x36   : > { %2167 = vsyncadd (%p44_p1), [#allocation9], 4294963200  ;;  %v1604_v0 = vld [vmem:[#allocation5 + $0xe0] sm:$0xf]  ;;  %v1786_v1 = vld [vmem:[#allocation5 + $0xec] sm:$0xf0] }
  0x37   : > { %v1784_v2 = vld [vmem:[#allocation5 + $0xe4] sm:$0xf]  ;;  %v1605_v3 = vor.u32 %v1786_v1, %v1604_v0  ;;  %v1606_v4 = vld [vmem:[#allocation5 + $0xf0] sm:$0xf0]  ;;  %v1612_v5 = vld [vmem:[#allocation5 + $0xe8] sm:$0xf] }
  0x38   : > { %v1787_v6 = vld [vmem:[#allocation5 + $0xf4] sm:$0xf0]  ;;  %v1609_v7 = vor.u32 %v1784_v2, %v1606_v4  ;;  %v1785_v9 = vld [vmem:[#allocation5 + $0xec] sm:$0xf]  ;;  %v1614_v10 = vld [vmem:[#allocation5 + $0xf8] sm:$0xf0] }
  0x39   : > { %v1613_v8 = vor.u32 %v1787_v6, %v1612_v5  ;;  %v1588_v11 = vld [vmem:[#allocation5 + $0xc0] sm:$0xf]  ;;  %529 = vmatpush.bf16.msra.mxu0 %v1605_v3  ;;  %v1617_v12 = vor.u32 %v1785_v9, %v1614_v10  ;;  %v1782_v13 = vld [vmem:[#allocation5 + $0xcc] sm:$0xf0]  ;;  %v1780_v14 = vld [vmem:[#allocation5 + $0xc4] sm:$0xf] }
  0x3a   : > { %v1590_v15 = vld [vmem:[#allocation5 + $0xd0] sm:$0xf0]  ;;  %558 = vmatpush.bf16.msra.mxu1 %v1609_v7  ;;  %v1589_v16 = vor.u32 %v1782_v13, %v1588_v11  ;;  %v1596_v18 = vld [vmem:[#allocation5 + $0xc8] sm:$0xf]  ;;  %v1783_v19 = vld [vmem:[#allocation5 + $0xd4] sm:$0xf0] }
  0x3b   : > { %587 = vmatpush.bf16.msra.mxu2 %v1613_v8  ;;  %v1593_v17 = vor.u32 %v1780_v14, %v1590_v15  ;;  %v1781_v20 = vld [vmem:[#allocation5 + $0xcc] sm:$0xf]  ;;  %616 = vmatpush.bf16.msra.mxu3 %v1617_v12  ;;  %v1597_v21 = vor.u32 %v1783_v19, %v1596_v18  ;;  %v1598_v22 = vld [vmem:[#allocation5 + $0xd8] sm:$0xf0]  ;;  %v1572_v23 = vld [vmem:[#allocation5 + $0xa0] sm:$0xf] }
  0x3c   : > { %v1778_v24 = vld [vmem:[#allocation5 + $0xac] sm:$0xf0]  ;;  %v1601_v25 = vor.u32 %v1781_v20, %v1598_v22  ;;  %v1776_v26 = vld [vmem:[#allocation5 + $0xa4] sm:$0xf]  ;;  %v1574_v27 = vld [vmem:[#allocation5 + $0xb0] sm:$0xf0] }
  0x3d   : > { %v1580_v28 = vld [vmem:[#allocation5 + $0xa8] sm:$0xf]  ;;  %530 = vmatpush.bf16.msra.mxu0 %v1589_v16  ;;  %v1573_v29 = vor.u32 %v1778_v24, %v1572_v23  ;;  %v1779_v30 = vld [vmem:[#allocation5 + $0xb4] sm:$0xf0]  ;;  %v1777_v31 = vld [vmem:[#allocation5 + $0xac] sm:$0xf]  ;;  %v1577_v33 = vor.u32 %v1776_v26, %v1574_v27 }
  0x3e   : > { %v1582_v32 = vld [vmem:[#allocation5 + $0xb8] sm:$0xf0]  ;;  %559 = vmatpush.bf16.msra.mxu1 %v1593_v17  ;;  %v1581_v34 = vor.u32 %v1779_v30, %v1580_v28  ;;  %v1556_v35 = vld [vmem:[#allocation5 + $0x80] sm:$0xf]  ;;  %v1774_v36 = vld [vmem:[#allocation5 + $0x8c] sm:$0xf0] }
  0x3f   : > { %588 = vmatpush.bf16.msra.mxu2 %v1597_v21  ;;  %v1772_v37 = vld [vmem:[#allocation5 + $0x84] sm:$0xf]  ;;  %617 = vmatpush.bf16.msra.mxu3 %v1601_v25  ;;  %v1585_v38 = vor.u32 %v1777_v31, %v1582_v32  ;;  %v1558_v39 = vld [vmem:[#allocation5 + $0x90] sm:$0xf0]  ;;  %v1564_v40 = vld [vmem:[#allocation5 + $0x88] sm:$0xf]  ;;  %v1557_v44 = vor.u32 %v1774_v36, %v1556_v35 }
  0x40   : > { %v1775_v41 = vld [vmem:[#allocation5 + $0x94] sm:$0xf0]  ;;  %v1773_v42 = vld [vmem:[#allocation5 + $0x8c] sm:$0xf]  ;;  %v1566_v43 = vld [vmem:[#allocation5 + $0x98] sm:$0xf0]  ;;  %v1561_v45 = vor.u32 %v1772_v37, %v1558_v39 }
  0x41   : > { %531 = vmatpush.bf16.msra.mxu0 %v1573_v29  ;;  %v1565_v46 = vor.u32 %v1775_v41, %v1564_v40  ;;  %v1540_v47 = vld [vmem:[#allocation5 + $0x60] sm:$0xf]  ;;  %v1770_v48 = vld [vmem:[#allocation5 + $0x6c] sm:$0xf0]  ;;  %v1768_v49 = vld [vmem:[#allocation5 + $0x64] sm:$0xf]  ;;  %v1569_v50 = vor.u32 %v1773_v42, %v1566_v43 }
  0x42   : > { %560 = vmatpush.bf16.msra.mxu1 %v1577_v33  ;;  %v1542_v51 = vld [vmem:[#allocation5 + $0x70] sm:$0xf0]  ;;  %v1548_v52 = vld [vmem:[#allocation5 + $0x68] sm:$0xf]  ;;  %v1771_v53 = vld [vmem:[#allocation5 + $0x74] sm:$0xf0]  ;;  %v1541_v56 = vor.u32 %v1770_v48, %v1540_v47 }
  0x43   : > { %589 = vmatpush.bf16.msra.mxu2 %v1581_v34  ;;  %618 = vmatpush.bf16.msra.mxu3 %v1585_v38  ;;  %v1769_v54 = vld [vmem:[#allocation5 + $0x6c] sm:$0xf]  ;;  %v1550_v55 = vld [vmem:[#allocation5 + $0x78] sm:$0xf0]  ;;  %v1545_v57 = vor.u32 %v1768_v49, %v1542_v51  ;;  %v1549_v58 = vor.u32 %v1771_v53, %v1548_v52  ;;  %v1524_v59 = vld [vmem:[#allocation5 + $0x40] sm:$0xf] }
  0x44   : > { %v1766_v60 = vld [vmem:[#allocation5 + $0x4c] sm:$0xf0]  ;;  %v1764_v61 = vld [vmem:[#allocation5 + $0x44] sm:$0xf]  ;;  %v1553_v62 = vor.u32 %v1769_v54, %v1550_v55  ;;  %v1526_v63 = vld [vmem:[#allocation5 + $0x50] sm:$0xf0] }
  0x45   : > { %532 = vmatpush.bf16.msra.mxu0 %v1557_v44  ;;  %v1532_v0 = vld [vmem:[#allocation5 + $0x48] sm:$0xf]  ;;  %v1767_v1 = vld [vmem:[#allocation5 + $0x54] sm:$0xf0]  ;;  %v1765_v2 = vld [vmem:[#allocation5 + $0x4c] sm:$0xf]  ;;  %v1525_v4 = vor.u32 %v1766_v60, %v1524_v59  ;;  %v1529_v5 = vor.u32 %v1764_v61, %v1526_v63 }
  0x46   : > { %561 = vmatpush.bf16.msra.mxu1 %v1561_v45  ;;  %v1534_v3 = vld [vmem:[#allocation5 + $0x58] sm:$0xf0]  ;;  %v1533_v6 = vor.u32 %v1767_v1, %v1532_v0  ;;  %v1508_v7 = vld [vmem:[#allocation5 + $0x20] sm:$0xf]  ;;  %v1762_v8 = vld [vmem:[#allocation5 + $0x2c] sm:$0xf0] }
  0x47   : > { %590 = vmatpush.bf16.msra.mxu2 %v1565_v46  ;;  %619 = vmatpush.bf16.msra.mxu3 %v1569_v50  ;;  %v1760_v9 = vld [vmem:[#allocation5 + $0x24] sm:$0xf]  ;;  %v1537_v10 = vor.u32 %v1765_v2, %v1534_v3  ;;  %v1510_v11 = vld [vmem:[#allocation5 + $0x30] sm:$0xf0]  ;;  %v1516_v12 = vld [vmem:[#allocation5 + $0x28] sm:$0xf]  ;;  %v1509_v16 = vor.u32 %v1762_v8, %v1508_v7 }
  0x48   : > { %v1763_v13 = vld [vmem:[#allocation5 + $0x34] sm:$0xf0]  ;;  %v1761_v14 = vld [vmem:[#allocation5 + $0x2c] sm:$0xf]  ;;  %v1518_v15 = vld [vmem:[#allocation5 + $0x38] sm:$0xf0]  ;;  %v1513_v17 = vor.u32 %v1760_v9, %v1510_v11 }
  0x49   : > { %533 = vmatpush.bf16.msra.mxu0 %v1541_v56  ;;  %v1517_v18 = vor.u32 %v1763_v13, %v1516_v12  ;;  %v1492_v19 = vld [vmem:[#allocation5] sm:$0xf]  ;;  %v1758_v20 = vld [vmem:[#allocation5 + $0xc] sm:$0xf0]  ;;  %v1756_v21 = vld [vmem:[#allocation5 + $0x4] sm:$0xf]  ;;  %v1521_v22 = vor.u32 %v1761_v14, %v1518_v15 }
  0x4a   : > { %562 = vmatpush.bf16.msra.mxu1 %v1545_v57  ;;  %v1494_v23 = vld [vmem:[#allocation5 + $0x10] sm:$0xf0]  ;;  %v1500_v24 = vld [vmem:[#allocation5 + $0x8] sm:$0xf]  ;;  %v1759_v25 = vld [vmem:[#allocation5 + $0x14] sm:$0xf0]  ;;  %v1493_v28 = vor.u32 %v1758_v20, %v1492_v19 }
  0x4b   : > { %591 = vmatpush.bf16.msra.mxu2 %v1549_v58  ;;  %620 = vmatpush.bf16.msra.mxu3 %v1553_v62  ;;  %v1757_v26 = vld [vmem:[#allocation5 + $0xc] sm:$0xf]  ;;  %v1502_v27 = vld [vmem:[#allocation5 + $0x18] sm:$0xf0]  ;;  %v1497_v29 = vor.u32 %v1756_v21, %v1494_v23  ;;  %v1501_v30 = vor.u32 %v1759_v25, %v1500_v24  ;;  %v1752_v32 = vld [vmem:[%s2348_s11] sm:$0xff]  ;;  %s2652_s28 = scalar_lea.vmem [#allocation10], %s1469_s27 }
  0x4c   : > { %v1505_v31 = vor.u32 %v1757_v26, %v1502_v27  ;;  %v1753_v33 = vld [vmem:[%s2348_s11 + $0x8] sm:$0xff]  ;;  %v1811_v34 = vld [vmem:[#allocation8 + $0xb8] sm:$0xff]  ;;  %v1810_v38 = vld [vmem:[#allocation8 + $0xb0] sm:$0xff]  ;;  %s1820_s16 = sshll.u32 %s2248_s22, 5  ;;  %s1354_s13 = sshll.u32 %s2652_s28, 4  ;;  %s1355_s13 = int_to_ptr.vmem [resolvable:$true] %s1354_s13 }
  0x4d   : > { %534 = vmatpush.bf16.msra.mxu0 %v1525_v4  ;;  %v1795_v35 = vld [vmem:[#allocation8 + $0x38] sm:$0xff]  ;;  %v1794_v39 = vld [vmem:[#allocation8 + $0x30] sm:$0xff]  ;;  %v1809_v42 = vld [vmem:[#allocation8 + $0xa8] sm:$0xff]  ;;  %s1353_s6 = scalar_lea.hbm %s2697_s5, %s1820_s16  ;;  %s1342_s22 = scalar_lea.sflag [#allocation4], %s2342_s17 }
  0x4e   : > { %563 = vmatpush.bf16.msra.mxu1 %v1529_v5  ;;  %v1819_v36 = vld [vmem:[#allocation8 + $0xf8] sm:$0xff]  ;;  %v1818_v40 = vld [vmem:[#allocation8 + $0xf0] sm:$0xff]  ;;  %v1793_v43 = vld [vmem:[#allocation8 + $0x28] sm:$0xff]  ;;  %s1356_s12 = sshll.u32 %s1353_s6, 4  ;;  %s2132_s8 = scalar_lea.hbm %s2697_s5, 64  ;;  %s1357_s12 = int_to_ptr.hbm [resolvable:$true] %s1356_s12 }
  0x4f   : > { %592 = vmatpush.bf16.msra.mxu2 %v1533_v6  ;;  %621 = vmatpush.bf16.msra.mxu3 %v1537_v10  ;;  %v1803_v37 = vld [vmem:[#allocation8 + $0x78] sm:$0xff]  ;;  %v1802_v41 = vld [vmem:[#allocation8 + $0x70] sm:$0xff]  ;;  %v1817_v44 = vld [vmem:[#allocation8 + $0xe8] sm:$0xff]  ;;  %s2126_s14 = sshra.s32 %s1357_s12, 4  ;;  %s2127_s14 = int_to_ptr.hbm [resolvable:$true] %s2126_s14 }
  0x50   : > { %v1801_v45 = vld [vmem:[#allocation8 + $0x68] sm:$0xff]  ;;  %v1755_v47 = vld [vmem:[%s2348_s11 + $0x18] sm:$0xff]  ;;  %v1808_v48 = vld [vmem:[#allocation8 + $0xa0] sm:$0xff]  ;;  %s2128_s15 = scalar_lea.hbm %s2127_s14, 32  ;;  %p2133_p11 = scmp.lt.s32.totalorder %s2127_s14, %s2697_s5 }
  0x51   : > { %535 = vmatpush.bf16.msra.mxu0 %v1509_v16  ;;  %v1754_v46 = vld [vmem:[%s2348_s11 + $0x10] sm:$0xff]  ;;  %v1792_v49 = vld [vmem:[#allocation8 + $0x20] sm:$0xff]  ;;  %v1791_v52 = vld [vmem:[#allocation8 + $0x18] sm:$0xff]  ;;  %p2129_p1 = scmp.ne.s32.totalorder %s2127_s14, %s2128_s15  ;;  %p2134_p9 = scmp.lt.s32.totalorder %s2132_s8, %s2128_s15 }
  0x52   : > { %564 = vmatpush.bf16.msra.mxu1 %v1513_v17  ;;  %v1816_v50 = vld [vmem:[#allocation8 + $0xe0] sm:$0xff]  ;;  %v1799_v53 = vld [vmem:[#allocation8 + $0x58] sm:$0xff]  ;;  %v1790_v56 = vld [vmem:[#allocation8 + $0x10] sm:$0xff] }
  0x53   : > { %593 = vmatpush.bf16.msra.mxu2 %v1517_v18  ;;  %622 = vmatpush.bf16.msra.mxu3 %v1521_v22  ;;  %v1800_v51 = vld [vmem:[#allocation8 + $0x60] sm:$0xff]  ;;  %v1807_v54 = vld [vmem:[#allocation8 + $0x98] sm:$0xff]  ;;  %v1798_v57 = vld [vmem:[#allocation8 + $0x50] sm:$0xff]  ;;  %p2130_p4 = pnand %p2129_p1, %p2312_p3  ;;  %p2135_p2 = por %p2134_p9, %p2133_p11 }
  0x54   : > { %v1815_v55 = vld [vmem:[#allocation8 + $0xd8] sm:$0xff]  ;;  %v1789_v59 = vld [vmem:[#allocation8 + $0x8] sm:$0xff]  ;;  %v1806_v62 = vld [vmem:[#allocation8 + $0x90] sm:$0xff] }
  0x55   : > { %536 = vmatpush.bf16.msra.mxu0 %v1493_v28  ;;  %v335_v58 = vld [vmem:[#allocation7] sm:$0xf]  ;;  %v1797_v60 = vld [vmem:[#allocation8 + $0x48] sm:$0xff]  ;;  %v1814_v63 = vld [vmem:[#allocation8 + $0xd0] sm:$0xff]  ;;  %p2131_p8 = pneg %p2130_p4 }
  0x56   : > { %565 = vmatpush.bf16.msra.mxu1 %v1497_v29  ;;  %v2366_v61 = vperm.slane %v335_v58, 0  ;;  %v2368_v0 = vperm.slane %v335_v58, 1  ;;  %v1788_v1 = vld [vmem:[#allocation8] sm:$0xff]  ;;  %v1805_v4 = vld [vmem:[#allocation8 + $0x88] sm:$0xff]  ;;  %v2380_v11 = vperm.slane %v335_v58, 2  ;;  %v2383_v13 = vperm.slane %v335_v58, 3 }
  0x57   : > { %594 = vmatpush.bf16.msra.mxu2 %v1501_v30  ;;  %623 = vmatpush.bf16.msra.mxu3 %v1505_v31  ;;  %v1796_v2 = vld [vmem:[#allocation8 + $0x40] sm:$0xff]  ;;  %v1813_v5 = vld [vmem:[#allocation8 + $0xc8] sm:$0xff]  ;;  %p2136_p10 = pnand %p2135_p2, %p2131_p8 }
  0x58   : > { %537 = vmatmul.bf16.vlgmr.msra.gmra.mxu0 %v1752_v32  ;;  %v1804_v14 = vld [vmem:[#allocation8 + $0x80] sm:$0xff] }
  0x59   : > { %566 = vmatmul.bf16.vlgmr.msra.gmra.mxu1 %v1752_v32  ;;  %1209 = vmatpush.bf16.msrb.mxu0 %v1795_v35  ;;  %v1812_v15 = vld [vmem:[#allocation8 + $0xc0] sm:$0xff] }
  0x5a   : > { %595 = vmatmul.bf16.vlgmr.msra.gmra.mxu2 %v1752_v32  ;;  %624 = vmatmul.bf16.vlgmr.msra.gmra.mxu3 %v1752_v32 }
  0x5b   : > { %1267 = vmatpush.bf16.msrb.mxu2 %v1811_v34  ;;  %1296 = vmatpush.bf16.msrb.mxu3 %v1819_v36 }
  0x5c   : > { %1238 = vmatpush.bf16.msrb.mxu1 %v1803_v37 }
  0x5d   : > { %1210 = vmatpush.bf16.msrb.mxu0 %v1794_v39 }
  0x5f   : > { %1268 = vmatpush.bf16.msrb.mxu2 %v1810_v38  ;;  %1297 = vmatpush.bf16.msrb.mxu3 %v1818_v40 }
  0x60   : > { %1239 = vmatpush.bf16.msrb.mxu1 %v1802_v41 }
  0x61   : > { %1211 = vmatpush.bf16.msrb.mxu0 %v1793_v43 }
  0x63   : > { %1269 = vmatpush.bf16.msrb.mxu2 %v1809_v42  ;;  %1298 = vmatpush.bf16.msrb.mxu3 %v1817_v44 }
  0x64   : > { %1240 = vmatpush.bf16.msrb.mxu1 %v1801_v45 }
  0x65   : > { %1212 = vmatpush.bf16.msrb.mxu0 %v1792_v49 }
  0x67   : > { %1270 = vmatpush.bf16.msrb.mxu2 %v1808_v48  ;;  %1299 = vmatpush.bf16.msrb.mxu3 %v1816_v50 }
  0x68   : > { %542 = vmatmul.bf16.gmra.mxu0 %v1753_v33  ;;  %1241 = vmatpush.bf16.msrb.mxu1 %v1800_v51 }
  0x69   : > { %571 = vmatmul.bf16.gmra.mxu1 %v1753_v33  ;;  %1213 = vmatpush.bf16.msrb.mxu0 %v1791_v52 }
  0x6a   : > { %600 = vmatmul.bf16.gmra.mxu2 %v1753_v33  ;;  %629 = vmatmul.bf16.gmra.mxu3 %v1753_v33 }
  0x6b   : > { %1271 = vmatpush.bf16.msrb.mxu2 %v1807_v54  ;;  %1300 = vmatpush.bf16.msrb.mxu3 %v1815_v55 }
  0x6c   : > { %1242 = vmatpush.bf16.msrb.mxu1 %v1799_v53 }
  0x6d   : > { %1214 = vmatpush.bf16.msrb.mxu0 %v1790_v56 }
  0x6f   : > { %1272 = vmatpush.bf16.msrb.mxu2 %v1806_v62  ;;  %1301 = vmatpush.bf16.msrb.mxu3 %v1814_v63 }
  0x70   : > { %1243 = vmatpush.bf16.msrb.mxu1 %v1798_v57 }
  0x71   : > { %1215 = vmatpush.bf16.msrb.mxu0 %v1789_v59 }
  0x73   : > { %1273 = vmatpush.bf16.msrb.mxu2 %v1805_v4  ;;  %1302 = vmatpush.bf16.msrb.mxu3 %v1813_v5 }
  0x74   : > { %1244 = vmatpush.bf16.msrb.mxu1 %v1797_v60 }
  0x75   : > { %1216 = vmatpush.bf16.msrb.mxu0 %v1788_v1 }
  0x77   : > { %1274 = vmatpush.bf16.msrb.mxu2 %v1804_v14  ;;  %1303 = vmatpush.bf16.msrb.mxu3 %v1812_v15 }
  0x78   : > { %547 = vmatmul.bf16.gmra.mxu0 %v1754_v46  ;;  %1245 = vmatpush.bf16.msrb.mxu1 %v1796_v2 }
  0x79   : > { %576 = vmatmul.bf16.gmra.mxu1 %v1754_v46 }
  0x7a   : > { %605 = vmatmul.bf16.gmra.mxu2 %v1754_v46  ;;  %634 = vmatmul.bf16.gmra.mxu3 %v1754_v46 }
  0x88   : > { %552 = vmatmul.bf16.gmra.mxu0 %v1755_v47 }
  0x89   : > { %581 = vmatmul.bf16.gmra.mxu1 %v1755_v47 }
  0x8a   : > { %610 = vmatmul.bf16.gmra.mxu2 %v1755_v47  ;;  %639 = vmatmul.bf16.gmra.mxu3 %v1755_v47 }
  0xd5   : > { %v538_v3 = vpop.f32.mrf.mxu0 }
  0xd6   : > { %v2371_v6 = vadd.f32 %v538_v3, %v2366_v61  ;;  %v567_v7 = vpop.f32.mrf.mxu1 }
  0xd7   : > { %v2374_v8 = vadd.f32 %v567_v7, %v2368_v0 }
  0xd8   : > { %v677_v9 = vmul.f32 %v2371_v6, %v2371_v6  ;;  %v645_v7 = vmul.f32 0.5, %v2371_v6 }
  0xd9   : > { %v678_v10 = vmul.f32 %v2374_v8, %v2374_v8 }
  0xda   : > { %v709_v12 = vmul.f32 %v677_v9, %v2371_v6  ;;  %v646_v9 = vmul.f32 0.5, %v2374_v8 }
  0xdb   : > { %v710_v16 = vmul.f32 %v678_v10, %v2374_v8 }
  0xdc   : > { %v741_v17 = vmul.f32 0.044715, %v709_v12 }
  0xdd   : > { %v596_v18 = vpop.f32.mrf.mxu2  ;;  %v742_v19 = vmul.f32 0.044715, %v710_v16  ;;  %v625_v21 = vpop.f32.mrf.mxu3 }
  0xde   : > { %v597_v20 = vadd.f32 %v596_v18, %v2380_v11  ;;  %v540_v22 = vpop.f32.mrf.mxu0  ;;  %v773_v23 = vadd.f32 %v741_v17, %v2371_v6  ;;  %v2389_v24 = vadd.f32 %v625_v21, %v2383_v13  ;;  %v569_v26 = vpop.f32.mrf.mxu1 }
  0xdf   : > { %v2392_v25 = vadd.f32 %v540_v22, %v2366_v61  ;;  %v774_v27 = vadd.f32 %v742_v19, %v2374_v8  ;;  %v2396_v29 = vadd.f32 %v569_v26, %v2368_v0 }
  0xe0   : > { %v679_v28 = vmul.f32 %v597_v20, %v597_v20  ;;  %v805_v30 = vmul.f32 0.7978845, %v773_v23  ;;  %v680_v31 = vmul.f32 %v2389_v24, %v2389_v24  ;;  %v2435_v15 = vmul.f32 0.5, %v597_v20 }
  0xe1   : > { %v681_v32 = vmul.f32 %v2392_v25, %v2392_v25  ;;  %v806_v33 = vmul.f32 0.7978845, %v774_v27  ;;  %v682_v35 = vmul.f32 %v2396_v29, %v2396_v29  ;;  %v649_v26 = vmul.f32 0.5, %v2392_v25 }
  0xe2   : > { %v711_v34 = vmul.f32 %v679_v28, %v597_v20  ;;  %v712_v36 = vmul.f32 %v680_v31, %v2389_v24  ;;  %1928 = vtanh.f32 %v805_v30  ;;  %v650_v31 = vmul.f32 0.5, %v2396_v29 }
  0xe3   : > { %v713_v37 = vmul.f32 %v681_v32, %v2392_v25  ;;  %v714_v39 = vmul.f32 %v682_v35, %v2396_v29  ;;  %1930 = vtanh.f32 %v806_v33 }
  0xe4   : > { %v743_v38 = vmul.f32 0.044715, %v711_v34  ;;  %v744_v40 = vmul.f32 0.044715, %v712_v36 }
  0xe5   : > { %v745_v41 = vmul.f32 0.044715, %v713_v37  ;;  %v598_v42 = vpop.f32.mrf.mxu2  ;;  %v746_v44 = vmul.f32 0.044715, %v714_v39  ;;  %v627_v46 = vpop.f32.mrf.mxu3  ;;  %v648_v37 = vmul.f32 0.5, %v2389_v24 }
  0xe6   : > { %v775_v43 = vadd.f32 %v743_v38, %v597_v20  ;;  %v2408_v45 = vadd.f32 %v598_v42, %v2380_v11  ;;  %v543_v47 = vpop.f32.mrf.mxu0  ;;  %v776_v48 = vadd.f32 %v744_v40, %v2389_v24  ;;  %v2413_v50 = vadd.f32 %v627_v46, %v2383_v13  ;;  %v572_v52 = vpop.f32.mrf.mxu1 }
  0xe7   : > { %v777_v49 = vadd.f32 %v745_v41, %v2392_v25  ;;  %v2416_v51 = vadd.f32 %v543_v47, %v2366_v61  ;;  %v778_v54 = vadd.f32 %v746_v44, %v2396_v29  ;;  %v2422_v56 = vadd.f32 %v572_v52, %v2368_v0 }
  0xe8   : > { %v807_v53 = vmul.f32 0.7978845, %v775_v43  ;;  %v683_v55 = vmul.f32 %v2408_v45, %v2408_v45  ;;  %v808_v57 = vmul.f32 0.7978845, %v776_v48  ;;  %v684_v59 = vmul.f32 %v2413_v50, %v2413_v50  ;;  %v1929_v2 = vpop.eup %1928 }
  0xe9   : > { %v809_v58 = vmul.f32 0.7978845, %v777_v49  ;;  %v685_v60 = vmul.f32 %v2416_v51, %v2416_v51  ;;  %v810_v62 = vmul.f32 0.7978845, %v778_v54  ;;  %v686_v1 = vmul.f32 %v2422_v56, %v2422_v56  ;;  %v1931_v4 = vpop.eup %1930 }
  0xea   : > { %1932 = vtanh.f32 %v807_v53  ;;  %v715_v63 = vmul.f32 %v683_v55, %v2408_v45  ;;  %v716_v3 = vmul.f32 %v684_v59, %v2413_v50  ;;  %v869_v22 = vadd.f32 1.0, %v1929_v2 }
  0xeb   : > { %1934 = vtanh.f32 %v808_v57  ;;  %v717_v12 = vmul.f32 %v685_v60, %v2416_v51  ;;  %v718_v17 = vmul.f32 %v686_v1, %v2422_v56  ;;  %v870_v32 = vadd.f32 1.0, %v1931_v4 }
  0xec   : > { %1936 = vtanh.f32 %v809_v58  ;;  %v747_v5 = vmul.f32 0.044715, %v715_v63  ;;  %v748_v10 = vmul.f32 0.044715, %v716_v3  ;;  %v901_v40 = vmul.f32 %v869_v22, %v645_v7 }
  0xed   : > { %1938 = vtanh.f32 %v810_v62  ;;  %v601_v14 = vpop.f32.mrf.mxu2  ;;  %v630_v19 = vpop.f32.mrf.mxu3  ;;  %v749_v25 = vmul.f32 0.044715, %v717_v12  ;;  %v2459_v39 = vmul.f32 0.044715, %v718_v17  ;;  %v902_v47 = vmul.f32 %v870_v32, %v646_v9 }
  0xee   : > { %v779_v16 = vadd.f32 %v747_v5, %v2408_v45  ;;  %v2440_v18 = vadd.f32 %v601_v14, %v2380_v11  ;;  %v545_v21 = vpop.f32.mrf.mxu0  ;;  %v780_v6 = vadd.f32 %v748_v10, %v2413_v50  ;;  %v2444_v8 = vadd.f32 %v630_v19, %v2383_v13  ;;  %v574_v20 = vpop.f32.mrf.mxu1 }
  0xef   : > { %v2447_v23 = vadd.f32 %v545_v21, %v2366_v61  ;;  %v2451_v30 = vadd.f32 %v574_v20, %v2368_v0  ;;  %v651_v24 = vmul.f32 0.5, %v2408_v45  ;;  %v652_v54 = vmul.f32 0.5, %v2413_v50 }
  0xf0   : > { %v1933_v27 = vpop.eup %1932  ;;  %v811_v28 = vmul.f32 0.7978845, %v779_v16  ;;  %v812_v34 = vmul.f32 0.7978845, %v780_v6  ;;  %v687_v35 = vmul.f32 %v2440_v18, %v2440_v18  ;;  %v688_v29 = vmul.f32 %v2444_v8, %v2444_v8 }
  0xf1   : > { %v1935_v33 = vpop.eup %1934  ;;  %v689_v36 = vmul.f32 %v2447_v23, %v2447_v23  ;;  %v690_v44 = vmul.f32 %v2451_v30, %v2451_v30  ;;  %v871_v60 = vadd.f32 1.0, %v1933_v27  ;;  %v781_v9 = vadd.f32 %v749_v25, %v2416_v51 }
  0xf2   : > { %v1937_v38 = vpop.eup %1936  ;;  %1940 = vtanh.f32 %v811_v28  ;;  %v719_v48 = vmul.f32 %v687_v35, %v2440_v18  ;;  %v872_v62 = vadd.f32 1.0, %v1935_v33  ;;  %v720_v63 = vmul.f32 %v688_v29, %v2444_v8 }
  0xf3   : > { %v1939_v41 = vpop.eup %1938  ;;  %1942 = vtanh.f32 %v812_v34  ;;  %v721_v42 = vmul.f32 %v689_v36, %v2447_v23  ;;  %v873_v43 = vadd.f32 1.0, %v1937_v38  ;;  %v722_v50 = vmul.f32 %v690_v44, %v2451_v30 }
  0xf4   : > { %v874_v46 = vadd.f32 1.0, %v1939_v41  ;;  %v751_v12 = vmul.f32 0.044715, %v719_v48  ;;  %v813_v6 = vmul.f32 0.7978845, %v781_v9  ;;  %v904_v32 = vmul.f32 %v872_v62, %v648_v37 }
  0xf5   : > { %v753_v49 = vmul.f32 0.044715, %v721_v42  ;;  %v603_v52 = vpop.f32.mrf.mxu2  ;;  %v905_v53 = vmul.f32 %v873_v43, %v649_v26  ;;  %v632_v57 = vpop.f32.mrf.mxu3  ;;  %v903_v26 = vmul.f32 %v871_v60, %v2435_v15  ;;  %v2494_v34 = vmul.f32 0.044715, %v720_v63 }
  0xf6   : > { %v2470_v55 = vadd.f32 %v603_v52, %v2380_v11  ;;  %v548_v58 = vpop.f32.mrf.mxu0  ;;  %v906_v59 = vmul.f32 %v874_v46, %v650_v31  ;;  %v2474_v1 = vadd.f32 %v632_v57, %v2383_v13  ;;  %v577_v2 = vpop.f32.mrf.mxu1  ;;  %v754_v31 = vmul.f32 0.044715, %v722_v50 }
  0xf7   : > { %v2477_v45 = vadd.f32 %v548_v58, %v2366_v61  ;;  %v933_v3 = vpack.c.bf16 %v905_v53, %v901_v40  ;;  %v2481_v5 = vadd.f32 %v577_v2, %v2368_v0  ;;  %v785_v17 = vadd.f32 %v753_v49, %v2447_v23 }
  0xf8   : > { %v1941_v4 = vpop.eup %1940  ;;  %v934_v7 = vpack.c.bf16 %v906_v59, %v902_v47  ;;  %v691_v14 = vmul.f32 %v2470_v55, %v2470_v55  ;;  %v692_v19 = vmul.f32 %v2474_v1, %v2474_v1  ;;  %1944 = vtanh.f32 %v813_v6 }
  0xf9   : > { %v1943_v10 = vpop.eup %1942  ;;  %1217 = vmatmul.bf16.vlgmr.msrb.gmra.mxu0 %v933_v3  ;;  %v875_v16 = vadd.f32 1.0, %v1941_v4  ;;  %v693_v21 = vmul.f32 %v2477_v45, %v2477_v45  ;;  %v694_v20 = vmul.f32 %v2481_v5, %v2481_v5  ;;  %v817_v28 = vmul.f32 0.7978845, %v785_v17 }
  0xfa   : > { %1246 = vmatmul.bf16.vlgmr.msrb.gmra.mxu1 %v934_v7  ;;  %v876_v22 = vadd.f32 1.0, %v1943_v10  ;;  %v723_v35 = vmul.f32 %v691_v14, %v2470_v55  ;;  %v724_v25 = vmul.f32 %v692_v19, %v2474_v1  ;;  %v782_v47 = vadd.f32 %v2459_v39, %v2422_v56 }
  0xfb   : > { %v907_v27 = vmul.f32 %v875_v16, %v651_v24  ;;  %1946 = vtanh.f32 %v817_v28  ;;  %v725_v40 = vmul.f32 %v693_v21, %v2477_v45  ;;  %v726_v37 = vmul.f32 %v694_v20, %v2481_v5 }
  0xfc   : > { %v908_v33 = vmul.f32 %v876_v22, %v652_v54  ;;  %v653_v48 = vmul.f32 0.5, %v2416_v51  ;;  %v657_v49 = vmul.f32 0.5, %v2447_v23  ;;  %v786_v52 = vadd.f32 %v754_v31, %v2451_v30 }
  0xfd   : > { %v606_v36 = vpop.f32.mrf.mxu2  ;;  %v935_v38 = vpack.c.bf16 %v907_v27, %v903_v26  ;;  %v635_v15 = vpop.f32.mrf.mxu3  ;;  %v755_v53 = vmul.f32 0.044715, %v723_v35  ;;  %v814_v58 = vmul.f32 0.7978845, %v782_v47  ;;  %v756_v39 = vmul.f32 0.044715, %v724_v25 }
  0xfe   : > { %v2500_v41 = vadd.f32 %v606_v36, %v2380_v11  ;;  %v550_v29 = vpop.f32.mrf.mxu0  ;;  %v936_v42 = vpack.c.bf16 %v908_v33, %v904_v32  ;;  %v2504_v43 = vadd.f32 %v635_v15, %v2383_v13  ;;  %v579_v46 = vpop.f32.mrf.mxu1  ;;  %v2521_v60 = vmul.f32 0.044715, %v725_v40 }
  0xff   : > { %v2507_v44 = vadd.f32 %v550_v29, %v2366_v61  ;;  %1275 = vmatmul.bf16.vlgmr.msrb.gmra.mxu2 %v935_v38  ;;  %v2512_v24 = vadd.f32 %v579_v46, %v2368_v0  ;;  %v1945_v59 = vpop.eup %1944  ;;  %v818_v62 = vmul.f32 0.7978845, %v786_v52  ;;  %v783_v63 = vadd.f32 %v751_v12, %v2440_v18 }
 0x100   : > { %1304 = vmatmul.bf16.vlgmr.msrb.gmra.mxu3 %v936_v42  ;;  %v695_v54 = vmul.f32 %v2500_v41, %v2500_v41  ;;  %v696_v57 = vmul.f32 %v2504_v43, %v2504_v43  ;;  %v2524_v2 = vmul.f32 0.044715, %v726_v37  ;;  %v877_v3 = vadd.f32 1.0, %v1945_v59 }
 0x101   : > { %v1947_v51 = vpop.eup %1946  ;;  %v697_v23 = vmul.f32 %v2507_v44, %v2507_v44  ;;  %1948 = vtanh.f32 %v814_v58  ;;  %v698_v4 = vmul.f32 %v2512_v24, %v2512_v24  ;;  %v654_v7 = vmul.f32 0.5, %v2422_v56 }
 0x102   : > { %v881_v50 = vadd.f32 1.0, %v1947_v51  ;;  %1950 = vtanh.f32 %v818_v62  ;;  %v727_v9 = vmul.f32 %v695_v54, %v2500_v41  ;;  %v728_v10 = vmul.f32 %v696_v57, %v2504_v43 }
 0x103   : > { %v658_v14 = vmul.f32 0.5, %v2451_v30  ;;  %v787_v16 = vadd.f32 %v755_v53, %v2470_v55  ;;  %v909_v22 = vmul.f32 %v877_v3, %v653_v48  ;;  %v815_v20 = vmul.f32 0.7978845, %v783_v63 }
 0x104   : > { %v913_v6 = vmul.f32 %v881_v50, %v657_v49  ;;  %v729_v56 = vmul.f32 %v697_v23, %v2507_v44  ;;  %v730_v31 = vmul.f32 %v698_v4, %v2512_v24  ;;  %v655_v38 = vmul.f32 0.5, %v2440_v18 }
 0x105   : > { %v608_v12 = vpop.f32.mrf.mxu2  ;;  %v637_v19 = vpop.f32.mrf.mxu3  ;;  %v819_v30 = vmul.f32 0.7978845, %v787_v16  ;;  %1952 = vtanh.f32 %v815_v20  ;;  %v659_v25 = vmul.f32 0.5, %v2470_v55  ;;  %v784_v37 = vadd.f32 %v2494_v34, %v2444_v8 }
 0x106   : > { %v2536_v17 = vadd.f32 %v608_v12, %v2380_v11  ;;  %v553_v21 = vpop.f32.mrf.mxu0  ;;  %v2540_v26 = vadd.f32 %v637_v19, %v2383_v13  ;;  %v582_v28 = vpop.f32.mrf.mxu1  ;;  %v937_v33 = vpack.c.bf16 %v913_v6, %v909_v22  ;;  %v2559_v46 = vmul.f32 0.044715, %v727_v9 }
 0x107   : > { %v2543_v27 = vadd.f32 %v553_v21, %v2366_v61  ;;  %v2547_v32 = vadd.f32 %v582_v28, %v2368_v0  ;;  %v1949_v35 = vpop.eup %1948  ;;  %1954 = vtanh.f32 %v819_v30  ;;  %v2561_v47 = vmul.f32 0.044715, %v728_v10 }
 0x108   : > { %v699_v36 = vmul.f32 %v2536_v17, %v2536_v17  ;;  %v1951_v40 = vpop.eup %1950  ;;  %v700_v15 = vmul.f32 %v2540_v26, %v2540_v26  ;;  %v878_v42 = vadd.f32 1.0, %v1949_v35  ;;  %v788_v55 = vadd.f32 %v756_v39, %v2474_v1 }
 0x109   : > { %v701_v29 = vmul.f32 %v2543_v27, %v2543_v27  ;;  %1222 = vmatmul.bf16.gmra.mxu0 %v937_v33  ;;  %v882_v18 = vadd.f32 1.0, %v1951_v40  ;;  %v761_v48 = vmul.f32 0.044715, %v729_v56  ;;  %v762_v49 = vmul.f32 0.044715, %v730_v31 }
 0x10a   : > { %v702_v52 = vmul.f32 %v2547_v32, %v2547_v32  ;;  %v816_v53 = vmul.f32 0.7978845, %v784_v37  ;;  %v731_v54 = vmul.f32 %v699_v36, %v2536_v17  ;;  %v910_v57 = vmul.f32 %v878_v42, %v654_v7 }
 0x10b   : > { %v914_v58 = vmul.f32 %v882_v18, %v658_v14  ;;  %v820_v62 = vmul.f32 0.7978845, %v788_v55  ;;  %v1953_v34 = vpop.eup %1952  ;;  %v732_v63 = vmul.f32 %v700_v15, %v2540_v26  ;;  %v733_v51 = vmul.f32 %v701_v29, %v2543_v27 }
 0x10c   : > { %1956 = vtanh.f32 %v816_v53  ;;  %v879_v12 = vadd.f32 1.0, %v1953_v34  ;;  %v734_v14 = vmul.f32 %v702_v52, %v2547_v32  ;;  %v656_v19 = vmul.f32 0.5, %v2444_v8 }
 0x10d   : > { %v611_v59 = vpop.f32.mrf.mxu2  ;;  %v640_v39 = vpop.f32.mrf.mxu3  ;;  %v938_v50 = vpack.c.bf16 %v914_v58, %v910_v57  ;;  %1958 = vtanh.f32 %v820_v62  ;;  %v763_v21 = vmul.f32 0.044715, %v731_v54  ;;  %v660_v20 = vmul.f32 0.5, %v2474_v1 }
 0x10e   : > { %v2570_v23 = vadd.f32 %v611_v59, %v2380_v11  ;;  %v555_v3 = vpop.f32.mrf.mxu0  ;;  %v1955_v4 = vpop.eup %1954  ;;  %v2573_v9 = vadd.f32 %v640_v39, %v2383_v13  ;;  %v911_v56 = vmul.f32 %v879_v12, %v655_v38  ;;  %v789_v30 = vadd.f32 %v2521_v60, %v2477_v45 }
 0x10f   : > { %v2576_v7 = vadd.f32 %v555_v3, %v2366_v61  ;;  %v584_v10 = vpop.f32.mrf.mxu1  ;;  %v883_v16 = vadd.f32 1.0, %v1955_v4  ;;  %1251 = vmatmul.bf16.gmra.mxu1 %v938_v50  ;;  %v764_v8 = vmul.f32 0.044715, %v732_v63  ;;  %v765_v31 = vmul.f32 0.044715, %v733_v51 }
 0x110   : > { %v703_v22 = vmul.f32 %v2570_v23, %v2570_v23  ;;  %v2583_v6 = vadd.f32 %v584_v10, %v2368_v0  ;;  %v704_v61 = vmul.f32 %v2573_v9, %v2573_v9  ;;  %v793_v35 = vadd.f32 %v761_v48, %v2507_v44 }
 0x111   : > { %v915_v28 = vmul.f32 %v883_v16, %v659_v25  ;;  %v705_v33 = vmul.f32 %v2576_v7, %v2576_v7  ;;  %v2593_v0 = vmul.f32 0.044715, %v734_v14  ;;  %v661_v1 = vmul.f32 0.5, %v2477_v45 }
 0x112   : > { %v1957_v36 = vpop.eup %1956  ;;  %v821_v15 = vmul.f32 0.7978845, %v789_v30  ;;  %v735_v38 = vmul.f32 %v703_v22, %v2570_v23  ;;  %v706_v25 = vmul.f32 %v2583_v6, %v2583_v6  ;;  %v665_v42 = vmul.f32 0.5, %v2507_v44 }
 0x113   : > { %v939_v40 = vpack.c.bf16 %v915_v28, %v911_v56  ;;  %v880_v60 = vadd.f32 1.0, %v1957_v36  ;;  %v1959_v37 = vpop.eup %1958  ;;  %v736_v18 = vmul.f32 %v704_v61, %v2573_v9  ;;  %v825_v52 = vmul.f32 0.7978845, %v793_v35 }
 0x114   : > { %1960 = vtanh.f32 %v821_v15  ;;  %v737_v45 = vmul.f32 %v705_v33, %v2576_v7  ;;  %v884_v53 = vadd.f32 1.0, %v1959_v37  ;;  %v790_v57 = vadd.f32 %v2524_v2, %v2481_v5 }
 0x115   : > { %v613_v29 = vpop.f32.mrf.mxu2  ;;  %1280 = vmatmul.bf16.gmra.mxu2 %v939_v40  ;;  %v642_v48 = vpop.f32.mrf.mxu3  ;;  %1962 = vtanh.f32 %v825_v52  ;;  %v662_v58 = vmul.f32 0.5, %v2481_v5  ;;  %v767_v59 = vmul.f32 0.044715, %v735_v38  ;;  %v912_v62 = vmul.f32 %v880_v60, %v656_v19 }
 0x116   : > { %v2602_v55 = vadd.f32 %v613_v29, %v2380_v11  ;;  %v2606_v54 = vadd.f32 %v642_v48, %v2383_v13  ;;  %v794_v11 = vadd.f32 %v762_v49, %v2512_v24  ;;  %v916_v34 = vmul.f32 %v884_v53, %v660_v20 }
 0x117   : > { %v822_v63 = vmul.f32 0.7978845, %v790_v57  ;;  %v738_v51 = vmul.f32 %v706_v25, %v2583_v6  ;;  %v791_v13 = vadd.f32 %v2559_v46, %v2500_v41  ;;  %v795_v2 = vadd.f32 %v763_v21, %v2536_v17 }
 0x118   : > { %v707_v44 = vmul.f32 %v2602_v55, %v2602_v55  ;;  %v826_v39 = vmul.f32 0.7978845, %v794_v11  ;;  %v769_v3 = vmul.f32 0.044715, %v737_v45  ;;  %v940_v4 = vpack.c.bf16 %v916_v34, %v912_v62 }
 0x119   : > { %v708_v50 = vmul.f32 %v2606_v54, %v2606_v54  ;;  %1964 = vtanh.f32 %v822_v63  ;;  %v823_v10 = vmul.f32 0.7978845, %v791_v13  ;;  %v827_v12 = vmul.f32 0.7978845, %v795_v2 }
 0x11a   : > { %v1961_v5 = vpop.eup %1960  ;;  %v739_v49 = vmul.f32 %v707_v44, %v2602_v55  ;;  %1966 = vtanh.f32 %v826_v39  ;;  %v768_v14 = vmul.f32 0.044715, %v736_v18  ;;  %1309 = vmatmul.bf16.gmra.mxu3 %v940_v4  ;;  %v666_v19 = vmul.f32 0.5, %v2512_v24 }
 0x11b   : > { %v885_v16 = vadd.f32 1.0, %v1961_v5  ;;  %v792_v46 = vadd.f32 %v2561_v47, %v2504_v43  ;;  %v1963_v21 = vpop.eup %1962  ;;  %v770_v22 = vmul.f32 0.044715, %v738_v51  ;;  %v663_v20 = vmul.f32 0.5, %v2500_v41 }
 0x11c   : > { %1968 = vtanh.f32 %v823_v10  ;;  %v796_v61 = vadd.f32 %v764_v8, %v2540_v26  ;;  %v740_v56 = vmul.f32 %v708_v50, %v2606_v54  ;;  %v889_v28 = vadd.f32 1.0, %v1963_v21 }
 0x11d   : > { %1970 = vtanh.f32 %v827_v12  ;;  %v824_v30 = vmul.f32 0.7978845, %v792_v46  ;;  %v771_v33 = vmul.f32 0.044715, %v739_v49  ;;  %v797_v36 = vadd.f32 %v765_v31, %v2543_v27 }
 0x11e   : > { %v828_v35 = vmul.f32 0.7978845, %v796_v61  ;;  %v801_v24 = vadd.f32 %v769_v3, %v2576_v7  ;;  %v917_v47 = vmul.f32 %v885_v16, %v661_v1  ;;  %v921_v15 = vmul.f32 %v889_v28, %v665_v42 }
 0x11f   : > { %v1965_v40 = vpop.eup %1964  ;;  %1972 = vtanh.f32 %v824_v30  ;;  %v798_v41 = vadd.f32 %v2593_v0, %v2547_v32  ;;  %v829_v25 = vmul.f32 0.7978845, %v797_v36  ;;  %v802_v18 = vadd.f32 %v770_v22, %v2583_v6 }
 0x120   : > { %v1967_v38 = vpop.eup %1966  ;;  %v886_v8 = vadd.f32 1.0, %v1965_v40  ;;  %1974 = vtanh.f32 %v828_v35  ;;  %v833_v60 = vmul.f32 0.7978845, %v801_v24  ;;  %v941_v29 = vpack.c.bf16 %v921_v15, %v917_v47 }
 0x121   : > { %v890_v37 = vadd.f32 1.0, %v1967_v38  ;;  %v830_v48 = vmul.f32 0.7978845, %v798_v41  ;;  %v772_v52 = vmul.f32 0.044715, %v740_v56  ;;  %v667_v1 = vmul.f32 0.5, %v2536_v17 }
 0x122   : > { %v1969_v31 = vpop.eup %1968  ;;  %v918_v45 = vmul.f32 %v886_v8, %v662_v58  ;;  %1976 = vtanh.f32 %v829_v25  ;;  %1227 = vmatmul.bf16.gmra.mxu0 %v941_v29  ;;  %v834_v57 = vmul.f32 0.7978845, %v802_v18  ;;  %v799_v11 = vadd.f32 %v767_v59, %v2570_v23 }
 0x123   : > { %v1971_v42 = vpop.eup %1970  ;;  %v922_v53 = vmul.f32 %v890_v37, %v666_v19  ;;  %v887_v0 = vadd.f32 1.0, %v1969_v31  ;;  %1978 = vtanh.f32 %v833_v60  ;;  %v803_v62 = vadd.f32 %v771_v33, %v2602_v55 }
 0x124   : > { %v891_v44 = vadd.f32 1.0, %v1971_v42  ;;  %1980 = vtanh.f32 %v830_v48  ;;  %v664_v58 = vmul.f32 0.5, %v2504_v43  ;;  %v831_v2 = vmul.f32 0.7978845, %v799_v11 }
 0x125   : > { %v1973_v34 = vpop.eup %1972  ;;  %v942_v63 = vpack.c.bf16 %v922_v53, %v918_v45  ;;  %v919_v51 = vmul.f32 %v887_v0, %v663_v20  ;;  %1982 = vtanh.f32 %v834_v57  ;;  %v835_v3 = vmul.f32 0.7978845, %v803_v62 }
 0x126   : > { %v1975_v17 = vpop.eup %1974  ;;  %v923_v39 = vmul.f32 %v891_v44, %v667_v1  ;;  %v888_v13 = vadd.f32 1.0, %v1973_v34  ;;  %v668_v4 = vmul.f32 0.5, %v2540_v26  ;;  %v800_v5 = vadd.f32 %v768_v14, %v2573_v9 }
 0x127   : > { %1256 = vmatmul.bf16.gmra.mxu1 %v942_v63  ;;  %v892_v50 = vadd.f32 1.0, %v1975_v17  ;;  %v804_v59 = vadd.f32 %v772_v52, %v2606_v54  ;;  %1984 = vtanh.f32 %v831_v2  ;;  %v673_v22 = vmul.f32 0.5, %v2576_v7 }
 0x128   : > { %v1977_v49 = vpop.eup %1976  ;;  %v943_v10 = vpack.c.bf16 %v923_v39, %v919_v51  ;;  %v920_v12 = vmul.f32 %v888_v13, %v664_v58  ;;  %1986 = vtanh.f32 %v835_v3  ;;  %v832_v46 = vmul.f32 0.7978845, %v800_v5 }
 0x129   : > { %v1979_v16 = vpop.eup %1978  ;;  %v924_v43 = vmul.f32 %v892_v50, %v668_v4  ;;  %v893_v19 = vadd.f32 1.0, %v1977_v49  ;;  %v836_v26 = vmul.f32 0.7978845, %v804_v59  ;;  %v669_v14 = vmul.f32 0.5, %v2543_v27 }
 0x12a   : > { %v1981_v21 = vpop.eup %1980  ;;  %1285 = vmatmul.bf16.gmra.mxu2 %v943_v10  ;;  %v897_v20 = vadd.f32 1.0, %v1979_v16  ;;  %1988 = vtanh.f32 %v832_v46  ;;  %v674_v35 = vmul.f32 0.5, %v2583_v6  ;;  %v670_v7 = vmul.f32 0.5, %v2547_v32 }
 0x12b   : > { %v1983_v61 = vpop.eup %1982  ;;  %v944_v56 = vpack.c.bf16 %v924_v43, %v920_v12  ;;  %1990 = vtanh.f32 %v836_v26  ;;  %v925_v33 = vmul.f32 %v893_v19, %v669_v14  ;;  %v894_v36 = vadd.f32 1.0, %v1981_v21 }
 0x12c   : > { %v929_v28 = vmul.f32 %v897_v20, %v673_v22  ;;  %v898_v30 = vadd.f32 1.0, %v1983_v61  ;;  %v675_v41 = vmul.f32 0.5, %v2602_v55  ;;  %v671_v29 = vmul.f32 0.5, %v2570_v23  ;;  %v1927_v23 = vld [vmem:[%s2696_s4] ss:$0 sm:$0xff] }
 0x12d   : > { %1314 = vmatmul.bf16.gmra.mxu3 %v944_v56  ;;  %v1985_v24 = vpop.eup %1984  ;;  %v926_v25 = vmul.f32 %v894_v36, %v670_v7  ;;  %v676_v6 = vmul.f32 0.5, %v2606_v54  ;;  %v672_v32 = vmul.f32 0.5, %v2573_v9 }
 0x12e   : > { %v1987_v40 = vpop.eup %1986  ;;  %v945_v47 = vpack.c.bf16 %v929_v28, %v925_v33  ;;  %v930_v15 = vmul.f32 %v898_v30, %v674_v35  ;;  %v895_v38 = vadd.f32 1.0, %v1985_v24 }
 0x12f   : > { %v899_v8 = vadd.f32 1.0, %v1987_v40 }
 0x130   : > { %v1989_v27 = vpop.eup %1988  ;;  %v946_v18 = vpack.c.bf16 %v930_v15, %v926_v25  ;;  %v927_v52 = vmul.f32 %v895_v38, %v671_v29 }
 0x131   : > { %v1991_v60 = vpop.eup %1990  ;;  %v931_v37 = vmul.f32 %v899_v8, %v675_v41  ;;  %v896_v48 = vadd.f32 1.0, %v1989_v27 }
 0x132   : > { %1232 = vmatmul.bf16.gmra.mxu0 %v945_v47  ;;  %v900_v31 = vadd.f32 1.0, %v1991_v60 }
 0x133   : > { %v947_v1 = vpack.c.bf16 %v931_v37, %v927_v52  ;;  %v928_v55 = vmul.f32 %v896_v48, %v672_v32 }
 0x134   : > { %v932_v45 = vmul.f32 %v900_v31, %v676_v6 }
 0x136   : > { %v948_v42 = vpack.c.bf16 %v932_v45, %v928_v55 }
 0x137   : > { %1261 = vmatmul.bf16.gmra.mxu1 %v946_v18 }
 0x13a   : > { %1290 = vmatmul.bf16.gmra.mxu2 %v947_v1 }
 0x13d   : > { %1319 = vmatmul.bf16.gmra.mxu3 %v948_v42 }
 0x176   : > { %v1218_v53 = vpop.f32.mrf.mxu0 }
 0x177   : > { %v1247_v0 = vpop.f32.mrf.mxu1  ;;  %v1219_v44 = vadd.f32 %v1927_v23, %v1218_v53 }
 0x179   : > { %v1248_v9 = vadd.f32 %v1247_v0, %v1219_v44 }
 0x17e   : > { %v1220_v57 = vpop.f32.mrf.mxu0 }
 0x17f   : > { %v1221_v62 = vadd.f32 %v1927_v23, %v1220_v57  ;;  %v1249_v34 = vpop.f32.mrf.mxu1 }
 0x181   : > { %v1250_v63 = vadd.f32 %v1249_v34, %v1221_v62 }
 0x182   : > { %v1276_v54 = vpop.f32.mrf.mxu2 }
 0x183   : > { %v1305_v11 = vpop.f32.mrf.mxu3  ;;  %v1277_v51 = vadd.f32 %v1276_v54, %v1248_v9 }
 0x185   : > { %v1306_v13 = vadd.f32 %v1305_v11, %v1277_v51 }
 0x186   : > { %v1223_v3 = vpop.f32.mrf.mxu0 }
 0x187   : > { %v1224_v10 = vadd.f32 %v1927_v23, %v1223_v3 }
 0x18a   : > { %v1278_v58 = vpop.f32.mrf.mxu2 }
 0x18b   : > { %v1279_v17 = vadd.f32 %v1278_v58, %v1250_v63  ;;  %v1307_v39 = vpop.f32.mrf.mxu3 }
 0x18c   : > { %v1252_v50 = vpop.f32.mrf.mxu1 }
 0x18d   : > { %v1308_v2 = vadd.f32 %v1307_v39, %v1279_v17  ;;  %v1253_v46 = vadd.f32 %v1252_v50, %v1224_v10 }
 0x18e   : > { %v1225_v5 = vpop.f32.mrf.mxu0 }
 0x18f   : > { %v1824_v4 = vpack.c.bf16 %v1308_v2, %v1306_v13  ;;  %v1226_v12 = vadd.f32 %v1927_v23, %v1225_v5 }
 0x191   : > { %1825 = vst [vmem:[%s2652_s28] sm:$0xff] %v1824_v4  }
 0x194   : > { %v1254_v49 = vpop.f32.mrf.mxu1 }
 0x195   : > { %v1255_v21 = vadd.f32 %v1254_v49, %v1226_v12 }
 0x198   : > { %v1281_v59 = vpop.f32.mrf.mxu2 }
 0x199   : > { %v1282_v22 = vadd.f32 %v1281_v59, %v1253_v46 }
 0x19d   : > { %v1310_v16 = vpop.f32.mrf.mxu3 }
 0x19e   : > { %v1311_v56 = vadd.f32 %v1310_v16, %v1282_v22 }
 0x19f   : > { %v1228_v43 = vpop.f32.mrf.mxu0 }
 0x1a0   : > { %v1283_v19 = vpop.f32.mrf.mxu2  ;;  %v1229_v35 = vadd.f32 %v1927_v23, %v1228_v43 }
 0x1a1   : > { %v1284_v20 = vadd.f32 %v1283_v19, %v1255_v21 }
 0x1a4   : > { %v1257_v26 = vpop.f32.mrf.mxu1 }
 0x1a5   : > { %v1312_v61 = vpop.f32.mrf.mxu3  ;;  %v1258_v47 = vadd.f32 %v1257_v26, %v1229_v35 }
 0x1a6   : > { %v1313_v14 = vadd.f32 %v1312_v61, %v1284_v20 }
 0x1a7   : > { %v1230_v30 = vpop.f32.mrf.mxu0 }
 0x1a8   : > { %v1829_v28 = vpack.c.bf16 %v1313_v14, %v1311_v56  ;;  %v1231_v24 = vadd.f32 %v1927_v23, %v1230_v30 }
 0x1aa   : > { %1841 = vst [vmem:[%s2652_s28 + $0x8] sm:$0xff] %v1829_v28  }
 0x1ac   : > { %v1259_v36 = vpop.f32.mrf.mxu1 }
 0x1ad   : > { %v1286_v33 = vpop.f32.mrf.mxu2  ;;  %v1260_v15 = vadd.f32 %v1259_v36, %v1231_v24 }
 0x1ae   : > { %v1287_v41 = vadd.f32 %v1286_v33, %v1258_v47 }
 0x1af   : > { %v1233_v7 = vpop.f32.mrf.mxu0 }
 0x1b0   : > { %v1315_v40 = vpop.f32.mrf.mxu3  ;;  %v1234_v48 = vadd.f32 %v1927_v23, %v1233_v7 }
 0x1b1   : > { %v1316_v25 = vadd.f32 %v1315_v40, %v1287_v41 }
 0x1b4   : > { %v1262_v60 = vpop.f32.mrf.mxu1 }
 0x1b5   : > { %v1288_v38 = vpop.f32.mrf.mxu2  ;;  %v1263_v32 = vadd.f32 %v1262_v60, %v1234_v48 }
 0x1b6   : > { %v1289_v8 = vadd.f32 %v1288_v38, %v1260_v15 }
 0x1b7   : > { %v1235_v18 = vpop.f32.mrf.mxu0 }
 0x1b8   : > { %v1317_v27 = vpop.f32.mrf.mxu3  ;;  %v1236_v31 = vadd.f32 %v1927_v23, %v1235_v18 }
 0x1b9   : > { %v1318_v29 = vadd.f32 %v1317_v27, %v1289_v8 }
 0x1bb   : > { %v1834_v37 = vpack.c.bf16 %v1318_v29, %v1316_v25 }
 0x1bc   : > { %v1264_v45 = vpop.f32.mrf.mxu1 }
 0x1bd   : > { %1842 = vst [vmem:[%s2652_s28 + $0x10] sm:$0xff] %v1834_v37   ;;  %v1291_v6 = vpop.f32.mrf.mxu2  ;;  %v1265_v1 = vadd.f32 %v1264_v45, %v1236_v31 }
 0x1be   : > { %v1292_v55 = vadd.f32 %v1291_v6, %v1263_v32 }
 0x1c0   : > { %v1320_v52 = vpop.f32.mrf.mxu3 }
 0x1c1   : > { %v1321_v23 = vadd.f32 %v1320_v52, %v1292_v55 }
 0x1c5   : > { %v1293_v42 = vpop.f32.mrf.mxu2 }
 0x1c6   : > { %v1294_v53 = vadd.f32 %v1293_v42, %v1265_v1 }
 0x1c8   : > { %v1322_v0 = vpop.f32.mrf.mxu3 }
 0x1c9   : > { %v1323_v57 = vadd.f32 %v1322_v0, %v1294_v53 }
 0x1cb   : > { %v1839_v54 = vpack.c.bf16 %v1323_v57, %v1321_v23 }
 0x1cd   : > { %1843 = vst [vmem:[%s2652_s28 + $0x18] sm:$0xff] %v1839_v54  }
 0x1ce   : > { %2139 = shalt.err (!%p2136_p10)
}
 0x1cf   : > { %s2195_s17 = smov 64   ;;  %s2196_s29 = smov 4  }
 0x1d0   : > { %1858 = dma.vmem_to_hbm [thread:$0]  (%p2312_p3), %s1355_s13, 512, %s1357_s12, %s1342_s22, %s2195_s17, %s2195_s17, %s2196_s29  }
 0x1d1 PF: > { %s1371_s28 = sand.u32 1, %s2174_s18   ;;  %p2706_p12 = scmp.ge.s32.totalorder %s2186_s21, 2 }
 0x1d2   : > { %s1372_s16 = scalar_lea.sflag [#allocation4], %s1371_s28 }
 0x1d3   : > { %p1875_p13 = pnand %p2706_p12, %p2262_p6 }
 0x1d5   : > { %p1876_p0 = pneg %p1875_p13 }
 0x1d7   : > { %2169 = dma.done.wait (%p1876_p0), %s1372_s16, 512  }
 0x1d8   : > { %2171 = vsyncadd (%p1876_p0), %s1372_s16, 4294966784  ;;  %p20_p5 = scmp.ge.s32.totalorder %s2299_s30, 4   ;;  %s2707_s18 = smov %s2178_s19 }
 0x1d9   : > { %s2708_s19 = smov %s2182_s20  ;;  %s2709_s20 = smov %s2308_s9 }
 0x1da   : > { %s2710_s21 = smov %s2299_s30  ;;  %22 = sbr.rel (!%p20_p5) target bundleno = 7 (0x7), region = 97 }
 0x1df   :  { %1378 = vsyncpa [#allocation3], 1 }
 0x1e0   :  { %1380 = vsyncpa [#allocation3 + $0x1], 1 }
 0x1e1   :  { %1381 = vsyncpa [#allocation6], 1 }
 0x1e2   :  { %1382 = vsyncpa [#allocation9], 1 }
 0x1e3   :  { %1383 = vsyncpa [#allocation4], 1 }
 0x1e4   :  { %1385 = vsyncpa [#allocation4 + $0x1], 1 }

</bundles_post_ra>
